<compile_context>
chip_gen: v5e
topology: v5e:2x2
jax: 0.10.0
libtpu: 0.0.40
codegen_flags: <defaults>
</compile_context>

<pallas_src>
import jax
import jax.numpy as jnp
import numpy as np
from jax.experimental import pallas as pl
from jax.experimental.pallas import tpu as pltpu


def _round_up(x, m):
    return ((x + m - 1) // m) * m


# ------------------------------------------------------------------ fused Pallas kernel
def _fused_convt_bn_relu_kernel(x_ref, w_ref, scale_ref, shift_ref, o_ref):
    # Single MXU pass (bf16 x bf16 -> f32 accumulator); BN affine + ReLU fused in the
    # epilogue (cheap VPU work riding under the matmul/DMA), one lane-dense f32 store.
    y = jnp.dot(x_ref[...], w_ref[...], preferred_element_type=jnp.float32)
    o_ref[...] = jnp.maximum(y * scale_ref[...] + shift_ref[...], 0.0)


def fused_matmul_bn_relu(x4, w_bd, scale_l, shift_l, tm):
    """out4 = relu((x4 @ w_bd) * scale + shift).  x4:[M4,K] bf16, w_bd:[K,L] bf16."""
    M4, K = x4.shape
    K2, L = w_bd.shape
    assert K == K2 and M4 % tm == 0 and L % 128 == 0
    grid_m = M4 // tm
    return pl.pallas_call(
        _fused_convt_bn_relu_kernel,
        out_shape=jax.ShapeDtypeStruct((M4, L), jnp.float32),
        grid_spec=pltpu.PrefetchScalarGridSpec(
            num_scalar_prefetch=0,
            grid=(grid_m,),
            in_specs=[
                pl.BlockSpec((tm, K), lambda i: (i, 0)),
                pl.BlockSpec((K, L), lambda i: (0, 0)),
                pl.BlockSpec((1, L), lambda i: (0, 0)),
                pl.BlockSpec((1, L), lambda i: (0, 0)),
            ],
            out_specs=pl.BlockSpec((tm, L), lambda i: (i, 0)),
        ),
        compiler_params=pltpu.CompilerParams(
            dimension_semantics=("parallel",),        # no output revisiting -> megacore / 2-TC
            vmem_limit_bytes=32 * 1024 * 1024,        # raise v5e's 16 MiB scoped default
        ),
        cost_estimate=pl.CostEstimate(
            flops=2 * M4 * K * L,
            transcendentals=0,
            bytes_accessed=2 * (M4 * K + K * L) + 4 * (M4 * L + 2 * L),
        ),
    )(x4, w_bd, scale_l, shift_l)


# ---------------------------------------------------------------------- full forward
def conv_transpose_bn_relu(x_nchw, weight, gamma, beta, eps=1e-5):
    """x_nchw: [N,Cin,H,W]; weight: [Cin,Cout,KH,KW] (PyTorch ConvTranspose2d layout).

    stride == kernel_size, padding == 0 => no output overlap: the transposed conv is a
    per-pixel matmul [N*H*W, Cin] @ [Cin, Cout*KH*KW] followed by a pure re-layout."""
    N, Cin, H, W = x_nchw.shape
    Cin_w, Cout, KH, KW = weight.shape
    assert Cin == Cin_w
    CKK = Cout * KH * KW
    M = N * H * W
    HIGHEST = jax.lax.Precision.HIGHEST

    # ---- analytic BN statistics (tiny: O(M*Cin^2) + O(Cin^2*CKK); XLA glue) ----------
    x_flat = jnp.transpose(x_nchw, (0, 2, 3, 1)).reshape(M, Cin).astype(jnp.float32)
    w_flat = weight.reshape(Cin, CKK).astype(jnp.float32)
    col_sum = jnp.dot(jnp.sum(x_flat, axis=0), w_flat, precision=HIGHEST)      # (CKK,)
    gram = jnp.dot(x_flat.T, x_flat, precision=HIGHEST)                         # (Cin,Cin)
    col_sq = jnp.sum(w_flat * jnp.dot(gram, w_flat, precision=HIGHEST), axis=0)  # (CKK,)
    ch_sum = col_sum.reshape(Cout, KH * KW).sum(axis=1)
    ch_sq = col_sq.reshape(Cout, KH * KW).sum(axis=1)
    cnt = jnp.float32(N * H * KH * W * KW)
    mean = ch_sum / cnt
    var = ch_sq / cnt - mean * mean          # biased variance (training-mode BN)
    inv = jax.lax.rsqrt(var + eps)
    scale_ch = gamma.astype(jnp.float32) * inv
    shift_ch = beta.astype(jnp.float32) - mean * scale_ch

    # ---- lane packing: R conv-output pixels per 128-lane row (block-diagonal W) ------
    R = max(1, 128 // CKK) if CKK < 128 else 1
    R = min(R, max(1, 128 // Cin))           # keep contraction depth K = R*Cin <= MXU depth
    K = R * Cin
    L_raw = R * CKK
    L = _round_up(L_raw, 128)                # zero-pad columns -> full-lane stores

    # ---- row tiling: target >= 4 grid steps (v7x has 2 TCs), cap 1024 rows/block -----
    m4_raw = -(-M // R)
    tm = min(1024, _round_up(max(8, -(-m4_raw // 4)), 8))
    M4 = _round_up(m4_raw, tm)
    Mp = M4 * R

    x_pad = jnp.pad(x_flat, ((0, Mp - M), (0, 0))) if Mp != M else x_flat
    x4 = x_pad.reshape(M4, K).astype(jnp.bfloat16)

    w_bd = jnp.kron(jnp.eye(R, dtype=jnp.float32), w_flat)                 # (K, L_raw)
    scale_l = jnp.tile(jnp.repeat(scale_ch, KH * KW), R)                   # (L_raw,)
    shift_l = jnp.tile(jnp.repeat(shift_ch, KH * KW), R)
    if L != L_raw:
        w_bd = jnp.pad(w_bd, ((0, 0), (0, L - L_raw)))
        scale_l = jnp.pad(scale_l, (0, L - L_raw))
        shift_l = jnp.pad(shift_l, (0, L - L_raw))
    w_bd = w_bd.astype(jnp.bfloat16)

    # ---- the only pass over the big activation: matmul + BN + ReLU, lane-dense -------
    out4 = fused_matmul_bn_relu(x4, w_bd, scale_l[None, :], shift_l[None, :], tm)

    # Un-pad, scatter the 2x2 patches and go to NCHW in ONE fused XLA transpose.
    # TODO(synk): the scatter-to-NCHW could be folded into the output BlockSpec, but the
    # NCHW last dim is lane-sparse for small W; left to XLA as a single fused copy.
    out_flat = out4[:, :L_raw].reshape(Mp, CKK)[:M]
    out = out_flat.reshape(N, H, W, Cout, KH, KW)
    out = jnp.transpose(out, (0, 3, 1, 4, 2, 5)).reshape(N, Cout, H * KH, W * KW)
    return out


# ----------------------------------------------------------------- pure-JAX reference
def ref_forward(x, weight, gamma, beta, eps=1e-5):
    N, Cin, H, W = x.shape
    _, Cout, KH, KW = weight.shape
    y = jnp.einsum("nchw,cokl->nohkwl", x, weight,
                   precision=jax.lax.Precision.HIGHEST)
    y = y.reshape(N, Cout, H * KH, W * KW)
    mean = y.mean(axis=(0, 2, 3), keepdims=True)
    var = y.var(axis=(0, 2, 3), keepdims=True)              # biased, training-mode BN
    yhat = (y - mean) * jax.lax.rsqrt(var + eps)
    out = gamma[None, :, None, None] * yhat + beta[None, :, None, None]
    return jnp.maximum(out, 0.0)


if __name__ == "__main__":
    key = jax.random.PRNGKey(0)
    k_x, k_w, k_g, k_b = jax.random.split(key, 4)

    # small shapes: batch=2, in_channels=4, out_channels=8, spatial=16, kernel=stride=2
    N, Cin, Cout, H, W, Kk = 2, 4, 8, 16, 16, 2

    x = jax.random.normal(k_x, (N, Cin, H, W), dtype=jnp.float32)
    weight = jax.random.normal(k_w, (Cin, Cout, Kk, Kk), dtype=jnp.float32) * 0.2
    gamma = jax.random.uniform(k_g, (Cout,), minval=0.5, maxval=1.5, dtype=jnp.float32)
    beta = jax.random.normal(k_b, (Cout,), dtype=jnp.float32) * 0.1

    fwd = jax.jit(conv_transpose_bn_relu)
    out = jax.block_until_ready(fwd(x, weight, gamma, beta))
    assert out.shape == (N, Cout, H * Kk, W * Kk)

    ref = ref_forward(x, weight, gamma, beta)
    # bf16 single-pass MXU inputs vs. the f32 HIGHEST reference: tolerance sized for the
    # ~2^-9 relative rounding of x/w amplified by gamma * rsqrt(var) in the BN normalize.
    np.testing.assert_allclose(np.asarray(out), np.asarray(ref), atol=3e-2, rtol=3e-2)

    print("KERNEL_OK")
</pallas_src>

<mosaic_0001>
module attributes {stable_mosaic.version = 11 : i64} {
  func.func @_fused_convt_bn_relu_kernel(%arg0: i32, %arg1: memref<32x16xbf16, #tpu.memory_space<vmem>>, %arg2: memref<16x128xbf16, #tpu.memory_space<vmem>>, %arg3: memref<1x128xf32, #tpu.memory_space<vmem>>, %arg4: memref<1x128xf32, #tpu.memory_space<vmem>>, %arg5: memref<32x128xf32, #tpu.memory_space<vmem>>) attributes {dimension_semantics = [#tpu.dimension_semantics<parallel>], iteration_bounds = array<i64: 4>, scalar_prefetch = 0 : i64, scratch_operands = 0 : i64, tpu.core_type = #tpu.core_type<tc>, window_params = [{transform_indices = @transform_0, window_bounds = array<i64: 32, 16>}, {pipeline_mode = #tpu.pipeline_mode<synchronous>, transform_indices = @transform_1, window_bounds = array<i64: 16, 128>}, {pipeline_mode = #tpu.pipeline_mode<synchronous>, transform_indices = @transform_2, window_bounds = array<i64: 1, 128>}, {pipeline_mode = #tpu.pipeline_mode<synchronous>, transform_indices = @transform_3, window_bounds = array<i64: 1, 128>}, {transform_indices = @transform_4, window_bounds = array<i64: 32, 128>}]} {
    %c0 = arith.constant 0 : index
    %c0_0 = arith.constant 0 : index
    %0 = vector.load %arg1[%c0, %c0_0] : memref<32x16xbf16, #tpu.memory_space<vmem>>, vector<32x16xbf16>
    %c0_1 = arith.constant 0 : index
    %c0_2 = arith.constant 0 : index
    %1 = vector.load %arg2[%c0_1, %c0_2] : memref<16x128xbf16, #tpu.memory_space<vmem>>, vector<16x128xbf16>
    %cst = arith.constant dense<0.000000e+00> : vector<32x128xf32>
    %2 = tpu.matmul %0, %1, %cst {dimension_numbers = #tpu.dot_dimension_numbers<[1], [0], [0], [1], [0, 0, 1, 1], [], []>} : vector<32x16xbf16>, vector<16x128xbf16>, vector<32x128xf32> -> vector<32x128xf32>
    %c0_3 = arith.constant 0 : index
    %c0_4 = arith.constant 0 : index
    %3 = vector.load %arg3[%c0_3, %c0_4] : memref<1x128xf32, #tpu.memory_space<vmem>>, vector<1x128xf32>
    %4 = vector.broadcast %3 : vector<1x128xf32> to vector<32x128xf32>
    %5 = arith.mulf %2, %4 : vector<32x128xf32>
    %c0_5 = arith.constant 0 : index
    %c0_6 = arith.constant 0 : index
    %6 = vector.load %arg4[%c0_5, %c0_6] : memref<1x128xf32, #tpu.memory_space<vmem>>, vector<1x128xf32>
    %7 = vector.broadcast %6 : vector<1x128xf32> to vector<32x128xf32>
    %8 = arith.addf %5, %7 : vector<32x128xf32>
    %cst_7 = arith.constant 0.000000e+00 : f32
    %9 = vector.broadcast %cst_7 : f32 to vector<32x128xf32>
    %10 = arith.maximumf %8, %9 : vector<32x128xf32>
    %c0_8 = arith.constant 0 : index
    %c0_9 = arith.constant 0 : index
    %11 = vector.load %arg5[%c0_8, %c0_9] : memref<32x128xf32, #tpu.memory_space<vmem>>, vector<32x128xf32>
    tpu.vector_store %arg5[%c0_8, %c0_9], %10 {strides = array<i32>} : memref<32x128xf32, #tpu.memory_space<vmem>>, vector<32x128xf32>,
    return
  }
  func.func @transform_0(%arg0: i32) -> (i32, i32) {
    %c0_i32 = arith.constant 0 : i32
    %c0_i32_0 = arith.constant 0 : i32
    return %arg0, %c0_i32 : i32, i32
  }
  func.func @transform_1(%arg0: i32) -> (i32, i32) {
    %c0_i32 = arith.constant 0 : i32
    %c0_i32_0 = arith.constant 0 : i32
    %c0_i32_1 = arith.constant 0 : i32
    return %c0_i32, %c0_i32_0 : i32, i32
  }
  func.func @transform_2(%arg0: i32) -> (i32, i32) {
    %c0_i32 = arith.constant 0 : i32
    %c0_i32_0 = arith.constant 0 : i32
    %c0_i32_1 = arith.constant 0 : i32
    return %c0_i32, %c0_i32_0 : i32, i32
  }
  func.func @transform_3(%arg0: i32) -> (i32, i32) {
    %c0_i32 = arith.constant 0 : i32
    %c0_i32_0 = arith.constant 0 : i32
    %c0_i32_1 = arith.constant 0 : i32
    return %c0_i32, %c0_i32_0 : i32, i32
  }
  func.func @transform_4(%arg0: i32) -> (i32, i32) {
    %c0_i32 = arith.constant 0 : i32
    %c0_i32_0 = arith.constant 0 : i32
    return %arg0, %c0_i32 : i32, i32
  }
}

</mosaic_0001>

<bundles_post_ra>
// kernel: tile.12
= control target key start
LH: loop header
LB: loop body
LE: loop exit
PB: predicated region body
PF: predicated region fallthrough
CT: control target
= control target key end

     0   :  { %s67_s10 = smov 28   ;;  %s68_s11 = smov 20   ;;  %vm3_vm0 = vcmask 31744   ;;  %vm9_vm1 = vcmask 261344   ;;  %vm15_vm2 = vcmask 228544   ;;  %vm21_vm3 = vcmask 195744   ;;  %s111_s0 = inlined_call_operand.vmem [shape: f32[8,4], index: 0, kind: input, shape index: {}]   ;;  %s112_s1 = inlined_call_operand.vmem [shape: f32[32], index: 1, kind: output, shape index: {}]  }
   0x1   :  { %v53_v0 = vld [vmem:[%s111_s0 + $0x7] sm:$0x1]   ;;  %v55_v1 = vld [vmem:[%s111_s0 + $0x5] sm:$0x1]   ;;  %v57_v2 = vld [vmem:[%s111_s0 + $0x3] sm:$0x1]  }
   0x2   :  { %7 = vrot.lane.b32.xlu0 %v53_v0, %s67_s10  ;;  %19 = vrot.lane.b32.xlu1 %v55_v1, %s68_s11  ;;  %s69_s14 = smov 12   ;;  %v54_v3 = vld [vmem:[%s111_s0 + $0x6] sm:$0x1]   ;;  %v56_v4 = vld [vmem:[%s111_s0 + $0x4] sm:$0x1]   ;;  %s70_s21 = smov 24  }
   0x3   :  { %31 = vrot.lane.b32.xlu2 %v57_v2, %s69_s14  ;;  %v58_v5 = vld [vmem:[%s111_s0 + $0x2] sm:$0x1]   ;;  %s71_s22 = smov 16   ;;  %s72_s23 = smov 8   ;;  %v59_v6 = vld [vmem:[%s111_s0 + $0x1] sm:$0x1]  }
   0x4   :  { %s73_s26 = smov 4   ;;  %v2_v7 = vld [vmem:[%s111_s0] sm:$0x1]   ;;  %vm27_vm4 = vcmask 162944   ;;  %vm33_vm5 = vcmask 130144   ;;  %vm39_vm6 = vcmask 97344  }
   0x5   :  { %4 = vst.msk [vmem:[#allocation0] sm:$0x1] %vm3_vm0, %v2_v7   ;;  %vm45_vm7 = vcmask 64544  }
   0xa   :  { %13 = vrot.lane.b32.xlu0 %v54_v3, %s70_s21  ;;  %25 = vrot.lane.b32.xlu1 %v56_v4, %s71_s22 }
   0xb   :  { %37 = vrot.lane.b32.xlu2 %v58_v5, %s72_s23 }
  0x12   :  { %43 = vrot.lane.b32.xlu0 %v59_v6, %s73_s26 }
  0x5d   :  { %v32_v8 = vpop.permute.xlu2 %31  }
  0x65   :  { %v38_v9 = vpop.permute.xlu2 %37  }
  0x74   :  { %v8_v10 = vpop.permute.xlu0 %7   ;;  %v20_v11 = vpop.permute.xlu1 %19  }
  0x75   :  { %10 = vst.msk [vmem:[#allocation0] sm:$0x1] %vm9_vm1, %v8_v10  }
  0x7c   :  { %v14_v12 = vpop.permute.xlu0 %13   ;;  %v26_v13 = vpop.permute.xlu1 %25  }
  0x7d   :  { %16 = vst.msk [vmem:[#allocation0] sm:$0x1] %vm15_vm2, %v14_v12  }
  0x7e   :  { %22 = vst.msk [vmem:[#allocation0] sm:$0x1] %vm21_vm3, %v20_v11  }
  0x7f   :  { %28 = vst.msk [vmem:[#allocation0] sm:$0x1] %vm27_vm4, %v26_v13  }
  0x80   :  { %34 = vst.msk [vmem:[#allocation0] sm:$0x1] %vm33_vm5, %v32_v8  }
  0x81   :  { %40 = vst.msk [vmem:[#allocation0] sm:$0x1] %vm39_vm6, %v38_v9  }
  0x84   :  { %v44_v14 = vpop.permute.xlu0 %43  }
  0x85   :  { %46 = vst.msk [vmem:[#allocation0] sm:$0x1] %vm45_vm7, %v44_v14  }
  0x8c   :  { %v49_v15 = vld [vmem:[#allocation0] sm:$0x1] }
  0x8d   :  { %52 = vst [vmem:[%s112_s1] sm:$0x1] %v49_v15 }

// kernel: tile.13
= control target key start
LH: loop header
LB: loop body
LE: loop exit
PB: predicated region body
PF: predicated region fallthrough
CT: control target
= control target key end

     0   :  { %s22_s0 = inlined_call_operand.vmem [shape: f32[32], index: 0, kind: input, shape index: {}]   ;;  %s23_s1 = inlined_call_operand.vmem [shape: f32[4,32], index: 1, kind: output, shape index: {}]  }
   0x1   :  { %v4_v0 = vld [vmem:[%s22_s0] ss:$0 sm:$0xff] }
   0x2   :  { %5 = vst [vmem:[%s23_s1] sm:$0xf] %v4_v0 }

// kernel: tile.15
= control target key start
LH: loop header
LB: loop body
LE: loop exit
PB: predicated region body
PF: predicated region fallthrough
CT: control target
= control target key end

     0   :  { %s37_s8 = smov 32   ;;  %s38_s9 = smov 64   ;;  %vm7_vm0 = vcmask 261120   ;;  %vm13_vm1 = vcmask 1048320   ;;  %vm19_vm2 = vcmask 785920   ;;  %vm25_vm3 = vcmask 523520   ;;  %s55_s0 = inlined_call_operand.vmem [shape: f32[4,32], index: 0, kind: input, shape index: {}]   ;;  %s56_s1 = inlined_call_operand.vmem [shape: f32[1,128], index: 1, kind: output, shape index: {}]  }
   0x1   :  { %v4_v0 = vld [vmem:[%s55_s0] sm:$0xf]  ;;  %s36_s0 = smov 96  }
   0x2   :  { %5 = vst [vmem:[#allocation1] sm:$0xf] %v4_v0 }
   0x9   :  { %v10_v1 = vld [vmem:[#allocation1 + $0x3] sm:$0x1]   ;;  %v22_v2 = vld [vmem:[#allocation1 + $0x1] sm:$0x1]   ;;  %v16_v3 = vld [vmem:[#allocation1 + $0x2] sm:$0x1]  }
   0xa   :  { %11 = vrot.lane.b32.xlu0 %v10_v1, %s36_s0  ;;  %23 = vrot.lane.b32.xlu1 %v22_v2, %s37_s8  ;;  %v6_v4 = vld [vmem:[#allocation1] sm:$0x1]  }
   0xb   :  { %8 = vst.msk [vmem:[#allocation0] sm:$0x1] %vm7_vm0, %v6_v4  }
  0x12   :  { %17 = vrot.lane.b32.xlu0 %v16_v3, %s38_s9 }
  0x7c   :  { %v12_v5 = vpop.permute.xlu0 %11   ;;  %v24_v6 = vpop.permute.xlu1 %23  }
  0x7d   :  { %14 = vst.msk [vmem:[#allocation0] sm:$0x1] %vm13_vm1, %v12_v5  }
  0x84   :  { %v18_v7 = vpop.permute.xlu0 %17  }
  0x85   :  { %20 = vst.msk [vmem:[#allocation0] sm:$0x1] %vm19_vm2, %v18_v7  }
  0x86   :  { %26 = vst.msk [vmem:[#allocation0] sm:$0x1] %vm25_vm3, %v24_v6  }
  0x8d   :  { %v29_v8 = vld [vmem:[#allocation0] sm:$0x1] }
  0x8e   :  { %32 = vst [vmem:[%s56_s1] sm:$0x1] %v29_v8 }

// kernel: conv_transpose_bn_relu.1
= control target key start
LH: loop header
LB: loop body
LE: loop exit
PB: predicated region body
PF: predicated region fallthrough
CT: control target
= control target key end

     0   :  { %s402_s15 = smov 0   ;;  %s428_s0 = inlined_call_operand.vmem [shape: bf16[128,16], index: 0, kind: input, shape index: {}]   ;;  %s429_s1 = inlined_call_operand.vmem [shape: bf16[16,128], index: 1, kind: input, shape index: {}]   ;;  %s430_s2 = inlined_call_operand.vmem [shape: f32[1,128], index: 2, kind: input, shape index: {}]   ;;  %s431_s3 = inlined_call_operand.vmem [shape: f32[1,128], index: 3, kind: input, shape index: {}]   ;;  %s432_s4 = inlined_call_operand.vmem [shape: f32[128,128], index: 4, kind: output, shape index: {}]  }
   0x1 LB: > { %s330_s16 = sadd.s32 4294967295, %s375_s15   ;;  %p334_p0 = scmp.ge.s32.totalorder %s375_s15, 1  ;;  %s375_s15 = sphi %s402_s15, %s14_s15  }
   0x2   : > { %p163_p1 = scmp.lt.s32.totalorder %s375_s15, 5 }
   0x4   : > { %p164_p2 = pnand %p334_p0, %p163_p1 }
   0x5   : > { %s335_s19 = sshll.u32 (!%p164_p2), %s330_s16, 2 }
   0x6   : > { %167 = sbr.rel (%p164_p2) target bundleno = 157 (0x9d), region = 36  ;;  %p190_p3 = scmp.lt.s32.totalorder (!%p164_p2), %s335_s19, 15 }
   0xb   : > { %v357_v0 = vld [vmem:[%s429_s1] sm:$0xff]  ;;  %s434_s19 = smov (!%p190_p3, %s335_s19), 15  ;;  %vm224_vm0 = vcmask 130048  }
   0xc   : > { %238 = vmatpush.bf16.msra.mxu0 %v357_v0  ;;  %358 = vmatpush.bf16.msra.mxu1 %v357_v0  ;;  %s336_s20 = sshll.u32 %s434_s19, 2  ;;  %v367_v3 = vld [vmem:[%s430_s2] ss:$0 sm:$0xff]  ;;  %s338_s28 = sshll.u32 %s434_s19, 3 }
   0xd   : > { %s193_s23 = scalar_lea.vmem %s428_s0, %s336_s20  ;;  %v368_v4 = vld [vmem:[%s431_s3] ss:$0 sm:$0xff]  ;;  %s199_s5 = scalar_lea.vmem %s432_s4, %s338_s28 }
   0xe   : > { %v355_v1 = vld [vmem:[%s193_s23] sm:$0xff]  ;;  %v356_v2 = vld [vmem:[%s193_s23 + $0x8] sm:$0xff] }
   0xf   : > { %351 = vmatmul.msk.bf16.vlgmr.msra.gmra.mxu0 %vm224_vm0, %v355_v1  ;;  %352 = vmatmul.msk.bf16.vlgmr.msra.gmra.mxu1 %vm224_vm0, %v356_v2 }
  0x8c   : > { %v240_v5 = vpop.f32.mrf.mxu0  ;;  %v245_v6 = vpop.f32.mrf.mxu1 }
  0x8d   : > { %v254_v7 = vmul.f32 %v367_v3, %v240_v5  ;;  %v256_v8 = vmul.f32 %v367_v3, %v245_v6 }
  0x8f   : > { %v262_v9 = vadd.f32 %v368_v4, %v254_v7  ;;  %v264_v10 = vadd.f32 %v368_v4, %v256_v8 }
  0x91   : > { %v266_v11 = vmax.f32 %v262_v9, 0.0  ;;  %v268_v12 = vmax.f32 %v264_v10, 0.0 }
  0x93   : > { %270 = vst [vmem:[%s199_s5] sm:$0xff] %v266_v11 }
  0x94   : > { %272 = vst [vmem:[%s199_s5 + $0x10] sm:$0xff] %v268_v12  ;;  %v242_v13 = vpop.f32.mrf.mxu0  ;;  %v247_v14 = vpop.f32.mrf.mxu1 }
  0x95   : > { %v255_v15 = vmul.f32 %v367_v3, %v242_v13  ;;  %v257_v16 = vmul.f32 %v367_v3, %v247_v14 }
  0x97   : > { %v263_v17 = vadd.f32 %v368_v4, %v255_v15  ;;  %v265_v18 = vadd.f32 %v368_v4, %v257_v16 }
  0x99   : > { %v267_v19 = vmax.f32 %v263_v17, 0.0  ;;  %v269_v20 = vmax.f32 %v265_v18, 0.0 }
  0x9b   : > { %271 = vst [vmem:[%s199_s5 + $0x8] sm:$0xff] %v267_v19 }
  0x9c   : > { %273 = vst [vmem:[%s199_s5 + $0x18] sm:$0xff] %v269_v20 }
  0x9d PF: > { %s14_s15 = sadd.s32 1, %s375_s15  }
  0x9e   : > { %p11_p4 = scmp.ge.s32.totalorder %s14_s15, 6  }
  0xa0   :  { %13 = sbr.rel (!%p11_p4) target bundleno = 1 (0x1), region = 66 }

</bundles_post_ra>
